<compile_context>
chip_gen: v6e
topology: v6e:2x2x1
jax: 0.10.0
libtpu: 0.0.40
codegen_flags: <defaults>
</compile_context>

<pallas_src>
import functools

import jax
import jax.numpy as jnp
from jax.experimental import pallas as pl
from jax.experimental.pallas import tpu as pltpu

N = 256          # number of points
D = 2            # input dims == number of component kernels (one active dim each)
EPS = 1e-6

# Tile caps: modest sublane (row) tile to keep the elementwise chain in vregs,
# wider lane (col) tile for lane-dense, unmasked output stores.
MAX_TM = 256
MAX_TN = 512


def _choose_tile(n, cap):
    """Largest divisor of n that is <= cap, preferring >= 2 tiles per axis."""
    t = min(n, cap)
    while n % t != 0:
        t //= 2
    # Ensure >= 2 grid steps along this axis when n allows: gives the second
    # v7x TensorCore work and restores store/compute pipeline overlap.
    while t > 128 and n // t < 2:
        t //= 2
        while n % t != 0:
            t //= 2
    return max(t, 8)


def _product_kernel_body(ls_ref, x_ref, xt_ref, o_ref, *, num_kernels):
    """One (tm, tn) tile of the product-of-RBF covariance matrix.

    ls_ref : SMEM f32[num_kernels]   lengthscales
    x_ref  : VMEM (tm, d)            row points
    xt_ref : VMEM (d, tn)            column points (transposed, lane-dense)
    o_ref  : VMEM (tm, tn)           output tile
    """
    sq_total = None
    for k in range(num_kernels):
        inv_ls = 1.0 / ls_ref[k]                                  # scalar (SMEM)
        z_row = x_ref[:, k:k + 1].astype(jnp.float32) * inv_ls    # (tm, 1)
        z_col = xt_ref[k:k + 1, :].astype(jnp.float32) * inv_ls   # (1, tn) lane-dense
        diff = z_row - z_col                                      # (tm, tn) broadcast
        sq_k = diff * diff                                        # exact >=0, 0 on diag
        sq_total = sq_k if sq_total is None else sq_total + sq_k

    # gpytorch's per-kernel diagonal fill_(0) and clamp_min_(0) are subsumed by
    # the exact non-negative broadcast-difference form; single fused exp.
    o_ref[...] = jnp.exp(-0.5 * sq_total).astype(o_ref.dtype)


def product_kernel(x, lengthscales):
    """ProductKernel(RBF(active_dims=[0]), ..., RBF(active_dims=[d-1]))(x, x)."""
    n, d = x.shape
    assert lengthscales.shape == (d,)

    tm = _choose_tile(n, MAX_TM)
    tn = _choose_tile(n, MAX_TN)
    # TODO(synk): for ragged N (not a multiple of the chosen tiles) pad x and
    # slice the output; the shipped instantiation (N=256) is tile-aligned.
    assert n % tm == 0 and n % tn == 0

    kernel = functools.partial(_product_kernel_body, num_kernels=d)

    return pl.pallas_call(
        kernel,
        out_shape=jax.ShapeDtypeStruct((n, n), jnp.float32),
        grid=(n // tm, n // tn),
        in_specs=[
            pl.BlockSpec(memory_space=pltpu.MemorySpace.SMEM),       # lengthscales
            pl.BlockSpec((tm, d), lambda i, j: (i, 0)),              # x rows
            pl.BlockSpec((d, tn), lambda i, j: (0, j)),              # x.T cols (lane-dense)
        ],
        out_specs=pl.BlockSpec((tm, tn), lambda i, j: (i, j)),
        compiler_params=pltpu.CompilerParams(
            dimension_semantics=("parallel", "parallel")),
    )(lengthscales, x, x.T)


def product_kernel_reference(x, lengthscales):
    """Pure-JAX reference mirroring gpytorch's norms+matmul formulation."""
    n, d = x.shape
    out = jnp.ones((n, n), jnp.float32)
    eye = jnp.eye(n, dtype=jnp.float32)
    for k in range(d):
        zk = x[:, k:k + 1] / lengthscales[k]
        z_norm = jnp.sum(zk * zk, axis=-1, keepdims=True)
        sq = z_norm + z_norm.T - 2.0 * zk @ zk.T
        sq = sq * (1.0 - eye)          # diagonal fill 0 (x1 == x2)
        sq = jnp.maximum(sq, 0.0)
        out = out * jnp.exp(-0.5 * sq)
    return out


if __name__ == "__main__":
    key = jax.random.PRNGKey(0)
    x = jax.random.normal(key, (N, D), dtype=jnp.float32)

    # Deterministic parameter init, per Kernel.__init__:
    #   raw_lengthscale = zeros(...)  ->  lengthscale = clamp(softplus(0), eps, 1e5)
    raw_lengthscale = jnp.zeros((D,), dtype=jnp.float32)
    lengthscales = jnp.clip(jax.nn.softplus(raw_lengthscale), EPS, 1e5)

    out = product_kernel(x, lengthscales)
    out = jax.block_until_ready(out)

    ref = product_kernel_reference(x, lengthscales)
    assert out.shape == (N, N) and out.dtype == jnp.float32
    assert jnp.allclose(out, ref, atol=1e-5, rtol=1e-5), "mismatch vs reference"

    print("KERNEL_OK")
</pallas_src>

<mosaic_0001>
module attributes {stable_mosaic.version = 11 : i64} {
  func.func @_product_kernel_body(%arg0: i32, %arg1: i32, %arg2: memref<2xf32, #tpu.memory_space<smem>>, %arg3: memref<128x2xf32, #tpu.memory_space<vmem>>, %arg4: memref<2x128xf32, #tpu.memory_space<vmem>>, %arg5: memref<128x128xf32, #tpu.memory_space<vmem>>) attributes {dimension_semantics = [#tpu.dimension_semantics<parallel>, #tpu.dimension_semantics<parallel>], iteration_bounds = array<i64: 2, 2>, scalar_prefetch = 0 : i64, scratch_operands = 0 : i64, tpu.core_type = #tpu.core_type<tc>, window_params = [{transform_indices = @transform_0, window_bounds = array<i64: 2>}, {transform_indices = @transform_1, window_bounds = array<i64: 128, 2>}, {transform_indices = @transform_2, window_bounds = array<i64: 2, 128>}, {transform_indices = @transform_3, window_bounds = array<i64: 128, 128>}]} {
    %c0 = arith.constant 0 : index
    %0 = memref.load %arg2[%c0] : memref<2xf32, #tpu.memory_space<smem>>
    %cst = arith.constant 1.000000e+00 : f32
    %1 = arith.divf %cst, %0 : f32
    %c0_0 = arith.constant 0 : index
    %c0_1 = arith.constant 0 : index
    %2 = vector.load %arg3[%c0_0, %c0_1] : memref<128x2xf32, #tpu.memory_space<vmem>>, vector<128x1xf32>
    %3 = vector.broadcast %1 : f32 to vector<128x1xf32>
    %4 = arith.mulf %2, %3 : vector<128x1xf32>
    %c0_2 = arith.constant 0 : index
    %c0_3 = arith.constant 0 : index
    %5 = vector.load %arg4[%c0_2, %c0_3] : memref<2x128xf32, #tpu.memory_space<vmem>>, vector<1x128xf32>
    %6 = vector.broadcast %1 : f32 to vector<1x128xf32>
    %7 = arith.mulf %5, %6 : vector<1x128xf32>
    %8 = vector.broadcast %4 : vector<128x1xf32> to vector<128x128xf32>
    %9 = vector.broadcast %7 : vector<1x128xf32> to vector<128x128xf32>
    %10 = arith.subf %8, %9 : vector<128x128xf32>
    %11 = arith.mulf %10, %10 : vector<128x128xf32>
    %c1 = arith.constant 1 : index
    %12 = memref.load %arg2[%c1] : memref<2xf32, #tpu.memory_space<smem>>
    %cst_4 = arith.constant 1.000000e+00 : f32
    %13 = arith.divf %cst_4, %12 : f32
    %c0_5 = arith.constant 0 : index
    %c1_6 = arith.constant 1 : index
    %14 = vector.load %arg3[%c0_5, %c1_6] : memref<128x2xf32, #tpu.memory_space<vmem>>, vector<128x1xf32>
    %15 = vector.broadcast %13 : f32 to vector<128x1xf32>
    %16 = arith.mulf %14, %15 : vector<128x1xf32>
    %c1_7 = arith.constant 1 : index
    %c0_8 = arith.constant 0 : index
    %17 = vector.load %arg4[%c1_7, %c0_8] : memref<2x128xf32, #tpu.memory_space<vmem>>, vector<1x128xf32>
    %18 = vector.broadcast %13 : f32 to vector<1x128xf32>
    %19 = arith.mulf %17, %18 : vector<1x128xf32>
    %20 = vector.broadcast %16 : vector<128x1xf32> to vector<128x128xf32>
    %21 = vector.broadcast %19 : vector<1x128xf32> to vector<128x128xf32>
    %22 = arith.subf %20, %21 : vector<128x128xf32>
    %23 = arith.mulf %22, %22 : vector<128x128xf32>
    %24 = arith.addf %11, %23 : vector<128x128xf32>
    %cst_9 = arith.constant -5.000000e-01 : f32
    %25 = vector.broadcast %cst_9 : f32 to vector<128x128xf32>
    %26 = arith.mulf %25, %24 : vector<128x128xf32>
    %27 = math.exp %26 : vector<128x128xf32>
    %c0_10 = arith.constant 0 : index
    %c0_11 = arith.constant 0 : index
    %28 = vector.load %arg5[%c0_10, %c0_11] : memref<128x128xf32, #tpu.memory_space<vmem>>, vector<128x128xf32>
    tpu.vector_store %arg5[%c0_10, %c0_11], %27 {strides = array<i32>} : memref<128x128xf32, #tpu.memory_space<vmem>>, vector<128x128xf32>,
    return
  }
  func.func @transform_0(%arg0: i32, %arg1: i32) -> i32 {
    %c0_i32 = arith.constant 0 : i32
    %c0_i32_0 = arith.constant 0 : i32
    return %c0_i32 : i32
  }
  func.func @transform_1(%arg0: i32, %arg1: i32) -> (i32, i32) {
    %c0_i32 = arith.constant 0 : i32
    %c0_i32_0 = arith.constant 0 : i32
    return %arg0, %c0_i32 : i32, i32
  }
  func.func @transform_2(%arg0: i32, %arg1: i32) -> (i32, i32) {
    %c0_i32 = arith.constant 0 : i32
    %c0_i32_0 = arith.constant 0 : i32
    return %c0_i32, %arg1 : i32, i32
  }
  func.func @transform_3(%arg0: i32, %arg1: i32) -> (i32, i32) {
    %c0_i32 = arith.constant 0 : i32
    return %arg0, %arg1 : i32, i32
  }
}

</mosaic_0001>

<bundles_post_ra>
// kernel: tpu_custom_call.1
= control target key start
LH: loop header
LB: loop body
LE: loop exit
PB: predicated region body
PF: predicated region fallthrough
CT: control target
= control target key end

     0   :  { %8 = vsyncpa [#allocation4], 0  ;;  %s1278_s0 = inlined_call_operand.vmem [shape: f32[2], index: 0, kind: input, shape index: {}]   ;;  %s1279_s1 = inlined_call_operand.vmem [shape: f32[256,2], index: 1, kind: input, shape index: {}]   ;;  %s1280_s2 = inlined_call_operand.vmem [shape: f32[2,256], index: 2, kind: input, shape index: {}]   ;;  %s1281_s3 = inlined_call_operand.hbm [shape: f32[256,256], index: 3, kind: output, shape index: {}]  }
   0x1   :  { %9 = vsyncpa [#allocation3], 0 }
   0x2   :  { %11 = vsyncpa [#allocation3 + $0x1], 0  ;;  %s996_s12 = smov 0   ;;  %s998_s13 = smov 0  }
   0x3   :  { %s1000_s14 = smov 0   ;;  %s1002_s15 = smov 0  }
   0x4   :  { %s1004_s16 = smov 0   ;;  %s1006_s17 = smov 0  }
   0x5   :  { %s1008_s18 = smov 0   ;;  %s1010_s19 = smov 0  }
   0x6 LB: > { %s706_s20 = sadd.s32 4294967295, %s967_s19   ;;  %s707_s21 = sadd.s32 4294967294, %s967_s19   ;;  %s967_s19 = sphi %s1010_s19, %s17_s19   ;;  %s963_s18 = sphi %s1008_s18, %s1293_s18   ;;  %s959_s17 = sphi %s1006_s17, %s1292_s17   ;;  %s955_s16 = sphi %s1004_s16, %s1291_s16   ;;  %s951_s15 = sphi %s1002_s15, %s1290_s15   ;;  %s947_s14 = sphi %s1000_s14, %s1289_s14   ;;  %s943_s13 = sphi %s998_s13, %s1288_s13   ;;  %s939_s12 = sphi %s996_s12, %s1287_s12  }
   0x7   : > { %s26_s22 = sadd.s32 1, %s959_s17  ;;  %s29_s23 = sadd.s32 1, %s963_s18 }
   0x8   : > { %p27_p0 = scmp.ge.s32.totalorder %s26_s22, 2  ;;  %s111_s24 = sadd.s32 1, %s947_s14 }
   0x9   : > { %p121_p1 = scmp.ne.s32.totalorder %s947_s14, %s943_s13  ;;  %p122_p2 = scmp.eq.s32.totalorder %s706_s20, 3 }
   0xa   : > { %s1295_s22 = smov (%p27_p0, %s26_s22), 0  ;;  %s1297_s23 = smov (!%p27_p0, %s29_s23), %s963_s18 }
   0xb   : > { %s107_s25 = ssub.s32 %s959_s17, %s1295_s22  ;;  %p1048_p3 = por %p122_p2, %p121_p1 }
   0xc   : > { %p31_p4 = scmp.ge.s32.totalorder %s1297_s23, 2  ;;  %p127_p5 = scmp.ne.s32.totalorder %s943_s13, %s939_s12 }
   0xd   : > { %p128_p6 = scmp.eq.s32.totalorder %s707_s21, 3  ;;  %p708_p7 = scmp.ge.s32.totalorder %s967_s19, 1 }
   0xe   : > { %s1299_s23 = smov (%p31_p4, %s1297_s23), 0  ;;  %p135_p9 = scmp.lt.s32.totalorder %s967_s19, 5 }
   0xf   : > { %p1057_p8 = por %p128_p6, %p127_p5  ;;  %s106_s28 = ssub.s32 %s963_s18, %s1299_s23 }
  0x10   : > { %s108_s29 = sor.u32 %s107_s25, %s106_s28  ;;  %p1064_p10 = pnand %p708_p7, %p135_p9 }
  0x11   : > { %s1283_s27 = scalar_select %p1057_p8, 1, 0 }
  0x12   : > { %p109_p11 = scmp.eq.s32.totalorder %s108_s29, 0  ;;  %p1068_p12 = scmp.eq.s32.totalorder %s706_s20, 0 }
  0x13   : > { %p735_p13 = pneg %p1064_p10  ;;  %s148_s7 = sshll.u32 %s1278_s0, 4  ;;  %s149_s7 = int_to_ptr.vmem [resolvable:$true] %s148_s7 }
  0x14   : > { %s1078_s8 = scalar_select %p109_p11, %s947_s14, %s111_s24  }
  0x15   : > { %p736_p0 = pnand %p1068_p12, %p735_p13  ;;  %s856_s9 = scalar_lea.vmem %s149_s7, 16 }
  0x16   : > { %p857_p1 = scmp.ne.s32.totalorder %s149_s7, %s856_s9  ;;  %p864_p6 = scmp.lt.s32.totalorder %s149_s7, %s149_s7 }
  0x17   : > { %p858_p2 = pneg %p736_p0  ;;  %p865_p7 = scmp.lt.s32.totalorder %s856_s9, %s856_s9 }
  0x19   : > { %p859_p4 = pnand %p858_p2, %p857_p1  ;;  %p866_p9 = por %p865_p7, %p864_p6 }
  0x1b   : > { %p860_p5 = pneg %p859_p4 }
  0x1d   : > { %p867_p8 = pnand %p866_p9, %p860_p5 }
  0x1f   : > { %870 = shalt.err (!%p867_p8)
}
  0x20   : > { %s969_s10 = smov [#allocation2]   ;;  %177 = sbr.rel (%p1064_p10) target bundleno = 339 (0x153), region = 32 }
  0x21   : > { %738 = dma.vmem_to_smem (!%p736_p0), %s149_s7, 16, %s969_s10, [#allocation4]  }
  0x25   : > { %930 = dma.done.wait (%p1068_p12), [#allocation4], 16  }
  0x26   : > { %932 = vsyncadd (%p1068_p12), [#allocation4], 4294967280 }
  0x27   : > { %183 = sfence }
  0x28   : > { %s217_s11 = sld [smem:[#allocation2]]  ;;  %v970_v0 = vmov 0   ;;  %s714_s21 = sshll.u32 %s955_s16, 4  ;;  %v971_v41 = vmov 1  }
  0x29   : > { %s717_s20 = sld [smem:[#allocation2 + $0x1]]  ;;  %817 = vset.pattern.permute.xlu1 %v970_v0  ;;  %816 = vset.pattern.permute.xlu0 %v970_v0  ;;  %p207_p8 = scmp.lt.s32.totalorder %s714_s21, 31 }
  0x2a   : > { %p212_p10 = scmp.lt.s32.totalorder %s951_s15, 1 }
  0x2b   : > { %s1301_s21 = smov (!%p207_p8, %s714_s21), 31 }
  0x2c   : > { %s715_s24 = sshll.u32 %s1301_s21, 3 }
  0x2d   : > { %s1092_s29 = scalar_lea.vmem %s1279_s1, %s715_s24  ;;  %s724_s24 = sshll.u32 %s955_s16, 5 }
  0x2e   : > { %v218_v1 = vstv %s217_s11  ;;  %v223_v5 = vld [vmem:[%s1092_s29 + $0x10] sm:$0xff]  ;;  %v221_v6 = vld [vmem:[%s1092_s29] sm:$0xff]  ;;  %v224_v10 = vld [vmem:[%s1092_s29 + $0x18] sm:$0xff]  ;;  %s213_s5 = scalar_select %p212_p10, %s951_s15, 1 }
  0x2f   : > { %820 = vrcp.f32 %v218_v1  ;;  %v373_v2 = vstv %s717_s20  ;;  %v222_v11 = vld [vmem:[%s1092_s29 + $0x8] sm:$0xff]  ;;  %v225_v15 = vld [vmem:[%s1092_s29 + $0x20] sm:$0xff]  ;;  %v228_v18 = vld [vmem:[%s1092_s29 + $0x38] sm:$0xff]  ;;  %s203_s11 = sand.u32 1, %s943_s13   ;;  %s604_s25 = sadd.s32 %s951_s15, %s724_s24 }
  0x30   : > { %822 = vrcp.f32 %v373_v2  ;;  %v226_v14 = vld [vmem:[%s1092_s29 + $0x28] sm:$0xff]  ;;  %v227_v19 = vld [vmem:[%s1092_s29 + $0x30] sm:$0xff]  ;;  %v229_v23 = vld [vmem:[%s1092_s29 + $0x40] sm:$0xff]  ;;  %s716_s6 = sshll.u32 %s213_s5, 1  ;;  %v336_v2 = vlaneseq  ;;  %s1180_s20 = sshll.u32 %s203_s11, 7 }
  0x31   : > { %v230_v22 = vld [vmem:[%s1092_s29 + $0x48] sm:$0xff]  ;;  %v232_v26 = vld [vmem:[%s1092_s29 + $0x58] sm:$0xff]  ;;  %v231_v27 = vld [vmem:[%s1092_s29 + $0x50] sm:$0xff]  ;;  %s215_s10 = scalar_lea.vmem %s1280_s2, %s716_s6  ;;  %s1189_s21 = scalar_lea.vmem [#allocation5], %s1180_s20 }
  0x32   : > { %v234_v30 = vld [vmem:[%s1092_s29 + $0x68] sm:$0xff]  ;;  %v233_v31 = vld [vmem:[%s1092_s29 + $0x60] sm:$0xff]  ;;  %v236_v34 = vld [vmem:[%s1092_s29 + $0x78] sm:$0xff]  ;;  %s607_s28 = sshll.u32 %s1189_s21, 4  ;;  %s1227_s16 = scalar_lea.sflag [#allocation3], %s203_s11  ;;  %s1216_s28 = int_to_ptr.vmem [resolvable:$true] %s607_s28 }
  0x33   : > { %v235_v35 = vld [vmem:[%s1092_s29 + $0x70] sm:$0xff]  ;;  %s721_s29 = sshll.u32 %s604_s25, 7  ;;  %s871_s5 = scalar_lea.vmem %s1216_s28, 2048 }
  0x34   : > { %s1221_s15 = scalar_lea.hbm %s1281_s3, %s721_s29  ;;  %p872_p11 = scmp.ne.s32.totalorder %s1216_s28, %s871_s5 }
  0x35   : > { %s972_s6 = smov [#allocation5]  }
  0x36   : > { %p873_p12 = pnand %p872_p11, %p1048_p3  ;;  %s875_s7 = sshll.u32 %s972_s6, 4  ;;  %s876_s7 = int_to_ptr.vmem [resolvable:$false] %s875_s7 }
  0x37   : > { %s877_s9 = scalar_lea.vmem %s876_s7, 4096  ;;  %p878_p0 = scmp.lt.s32.totalorder %s1216_s28, %s876_s7 }
  0x38   : > { %p874_p13 = pneg %p873_p12  ;;  %p879_p1 = scmp.lt.s32.totalorder %s877_s9, %s871_s5 }
  0x3a   : > { %p880_p2 = por %p879_p1, %p878_p0 }
  0x3c   : > { %v821_v3 = vpop.eup %820  ;;  %p881_p4 = pnand %p880_p2, %p874_p13 }
  0x3d   : > { %v823_v4 = vpop.eup %822  ;;  %725 = vpush %v821_v3 }
  0x3e   : > { %727 = vpush %v823_v4 }
  0x6e   : > { %s726_s30 = spop %725 }
  0x6f   : > { %v1096_v7 = vstv %s726_s30  ;;  %s728_s4 = spop %727 }
  0x70   : > { %v240_v8 = vmul.f32 %v1096_v7, %v223_v5  ;;  %v238_v9 = vmul.f32 %v1096_v7, %v221_v6  ;;  %v241_v12 = vmul.f32 %v1096_v7, %v224_v10  ;;  %v239_v13 = vmul.f32 %v1096_v7, %v222_v11 }
  0x71   : > { %v243_v16 = vmul.f32 %v1096_v7, %v226_v14  ;;  %v242_v17 = vmul.f32 %v1096_v7, %v225_v15  ;;  %v245_v20 = vmul.f32 %v1096_v7, %v228_v18  ;;  %v244_v21 = vmul.f32 %v1096_v7, %v227_v19 }
  0x72   : > { %268 = vperm.xlu1 %817, %v240_v8   ;;  %258 = vperm.xlu0 %816, %v238_v9   ;;  %v247_v24 = vmul.f32 %v1096_v7, %v230_v22  ;;  %v246_v25 = vmul.f32 %v1096_v7, %v229_v23  ;;  %v249_v28 = vmul.f32 %v1096_v7, %v232_v26  ;;  %v376_v38 = vstv %s728_s4 }
  0x73   : > { %v248_v29 = vmul.f32 %v1096_v7, %v231_v27  ;;  %v251_v32 = vmul.f32 %v1096_v7, %v234_v30  ;;  %v250_v33 = vmul.f32 %v1096_v7, %v233_v31  ;;  %v253_v36 = vmul.f32 %v1096_v7, %v236_v34 }
  0x74   : > { %v252_v37 = vmul.f32 %v1096_v7, %v235_v35  ;;  %v378_v39 = vmul.f32 %v376_v38, %v222_v11  ;;  %v377_v40 = vmul.f32 %v376_v38, %v221_v6  ;;  %v379_v42 = vmul.f32 %v376_v38, %v223_v5  ;;  %v254_v6 = vld [vmem:[%s215_s10] sm:$0x1] }
  0x75   : > { %v380_v43 = vmul.f32 %v376_v38, %v224_v10  ;;  %v381_v44 = vmul.f32 %v376_v38, %v225_v15  ;;  %v382_v45 = vmul.f32 %v376_v38, %v226_v14  ;;  %v383_v46 = vmul.f32 %v376_v38, %v227_v19  ;;  %v393_v10 = vld [vmem:[%s215_s10 + $0x1] sm:$0x1] }
  0x76   : > { %273 = vperm.xlu1 %817, %v241_v12   ;;  %263 = vperm.xlu0 %816, %v239_v13   ;;  %v384_v47 = vmul.f32 %v376_v38, %v228_v18  ;;  %v385_v48 = vmul.f32 %v376_v38, %v229_v23  ;;  %v386_v49 = vmul.f32 %v376_v38, %v230_v22  ;;  %v337_v5 = vshrl.u32 %v336_v2, 7 }
  0x77   : > { %v387_v50 = vmul.f32 %v376_v38, %v231_v27  ;;  %v388_v51 = vmul.f32 %v376_v38, %v232_v26  ;;  %v389_v52 = vmul.f32 %v376_v38, %v233_v31  ;;  %v390_v53 = vmul.f32 %v376_v38, %v234_v30 }
  0x78   : > { %v391_v54 = vmul.f32 %v376_v38, %v235_v35  ;;  %v392_v55 = vmul.f32 %v376_v38, %v236_v34  ;;  %v255_v11 = vmul.f32 %v254_v6, %v1096_v7  ;;  %v338_v12 = vsub.s32 0, %v337_v5 }
  0x79   : > { %v394_v13 = vmul.f32 %v393_v10, %v376_v38 }
  0x7a   : > { %283 = vperm.xlu1 %817, %v243_v16   ;;  %278 = vperm.xlu0 %816, %v242_v17   ;;  %v1148_v16 = vrot.slane %v255_v11, %v338_v12 }
  0x7b   : > { %v1150_v17 = vrot.slane %v394_v13, %v338_v12 }
  0x7e   : > { %293 = vperm.xlu1 %817, %v245_v20   ;;  %288 = vperm.xlu0 %816, %v244_v21  }
  0x82   : > { %303 = vperm.xlu1 %817, %v247_v24   ;;  %298 = vperm.xlu0 %816, %v246_v25  }
  0x86   : > { %313 = vperm.xlu1 %817, %v249_v28   ;;  %308 = vperm.xlu0 %816, %v248_v29  }
  0x8a   : > { %323 = vperm.xlu1 %817, %v251_v32   ;;  %318 = vperm.xlu0 %816, %v250_v33  }
  0x8e   : > { %333 = vperm.xlu1 %817, %v253_v36   ;;  %328 = vperm.xlu0 %816, %v252_v37  }
  0x92   : > { %819 = vset.pattern.permute.xlu1 %v971_v41  ;;  %818 = vset.pattern.permute.xlu0 %v971_v41 }
  0x93   : > { %402 = vperm.xlu1 %819, %v378_v39   ;;  %397 = vperm.xlu0 %818, %v377_v40  }
  0x97   : > { %407 = vperm.xlu1 %819, %v379_v42   ;;  %412 = vperm.xlu0 %818, %v380_v43  }
  0x9b   : > { %417 = vperm.xlu1 %819, %v381_v44   ;;  %422 = vperm.xlu0 %818, %v382_v45  }
  0x9f   : > { %427 = vperm.xlu1 %819, %v383_v46   ;;  %432 = vperm.xlu0 %818, %v384_v47  }
  0xa3   : > { %437 = vperm.xlu1 %819, %v385_v48   ;;  %442 = vperm.xlu0 %818, %v386_v49  }
  0xa7   : > { %447 = vperm.xlu1 %819, %v387_v50   ;;  %452 = vperm.xlu0 %818, %v388_v51  }
  0xab   : > { %457 = vperm.xlu1 %819, %v389_v52   ;;  %462 = vperm.xlu0 %818, %v390_v53  }
  0xaf   : > { %467 = vperm.xlu1 %819, %v391_v54   ;;  %472 = vperm.xlu0 %818, %v392_v55  }
  0xed   : > { %v269_v56 = vpop.permute.xlu1 %268  ;;  %v259_v57 = vpop.permute.xlu0 %258 }
  0xee   : > { %v340_v18 = vsub.f32 %v259_v57, %v1148_v16  ;;  %v342_v23 = vsub.f32 %v269_v56, %v1148_v16 }
  0xf0   : > { %v356_v25 = vmul.f32 %v340_v18, %v340_v18  ;;  %v358_v36 = vmul.f32 %v342_v23, %v342_v23 }
  0xf1   : > { %v274_v58 = vpop.permute.xlu1 %273  ;;  %v264_v59 = vpop.permute.xlu0 %263 }
  0xf2   : > { %v341_v19 = vsub.f32 %v264_v59, %v1148_v16  ;;  %v343_v24 = vsub.f32 %v274_v58, %v1148_v16 }
  0xf4   : > { %v357_v26 = vmul.f32 %v341_v19, %v341_v19  ;;  %v359_v37 = vmul.f32 %v343_v24, %v343_v24 }
  0xf5   : > { %v284_v60 = vpop.permute.xlu1 %283  ;;  %v279_v61 = vpop.permute.xlu0 %278 }
  0xf6   : > { %v345_v29 = vsub.f32 %v284_v60, %v1148_v16  ;;  %v344_v38 = vsub.f32 %v279_v61, %v1148_v16 }
  0xf8   : > { %v361_v43 = vmul.f32 %v345_v29, %v345_v29  ;;  %v360_v54 = vmul.f32 %v344_v38, %v344_v38 }
  0xf9   : > { %v294_v62 = vpop.permute.xlu1 %293  ;;  %v289_v63 = vpop.permute.xlu0 %288 }
  0xfa   : > { %v347_v50 = vsub.f32 %v294_v62, %v1148_v16  ;;  %v346_v51 = vsub.f32 %v289_v63, %v1148_v16 }
  0xfc   : > { %v363_v6 = vmul.f32 %v347_v50, %v347_v50  ;;  %v362_v10 = vmul.f32 %v346_v51, %v346_v51 }
  0xfd   : > { %v1130_v0 = vpop.permute.xlu1 %303  ;;  %v299_v1 = vpop.permute.xlu0 %298 }
  0xfe   : > { %v348_v57 = vsub.f32 %v299_v1, %v1148_v16  ;;  %v349_v13 = vsub.f32 %v1130_v0, %v1148_v16 }
 0x100   : > { %v364_v19 = vmul.f32 %v348_v57, %v348_v57 }
 0x101   : > { %v1135_v3 = vpop.permute.xlu1 %313  ;;  %v1137_v4 = vpop.permute.xlu0 %308 }
 0x102   : > { %v351_v0 = vsub.f32 %v1135_v3, %v1148_v16 }
 0x105   : > { %v1139_v8 = vpop.permute.xlu1 %323  ;;  %v1141_v9 = vpop.permute.xlu0 %318 }
 0x109   : > { %v1144_v14 = vpop.permute.xlu1 %333  ;;  %v1146_v15 = vpop.permute.xlu0 %328 }
 0x10e   : > { %v403_v20 = vpop.permute.xlu1 %402  ;;  %v398_v21 = vpop.permute.xlu0 %397 }
 0x10f   : > { %v480_v22 = vsub.f32 %v403_v20, %v1150_v17  ;;  %v479_v7 = vsub.f32 %v398_v21, %v1150_v17 }
 0x111   : > { %v496_v27 = vmul.f32 %v480_v22, %v480_v22  ;;  %v495_v28 = vmul.f32 %v479_v7, %v479_v7 }
 0x112   : > { %v408_v30 = vpop.permute.xlu1 %407  ;;  %v413_v31 = vpop.permute.xlu0 %412 }
 0x113   : > { %v512_v32 = vadd.f32 %v496_v27, %v357_v26  ;;  %v511_v33 = vadd.f32 %v495_v28, %v356_v25  ;;  %v481_v34 = vsub.f32 %v408_v30, %v1150_v17  ;;  %v482_v35 = vsub.f32 %v413_v31, %v1150_v17 }
 0x114   : > { %v350_v27 = vsub.f32 %v1137_v4, %v1148_v16 }
 0x115   : > { %v528_v39 = vmul.f32 -0.5, %v512_v32  ;;  %v527_v40 = vmul.f32 -0.5, %v511_v33  ;;  %v497_v41 = vmul.f32 %v481_v34, %v481_v34  ;;  %v498_v42 = vmul.f32 %v482_v35, %v482_v35 }
 0x116   : > { %v418_v44 = vpop.permute.xlu1 %417  ;;  %v423_v45 = vpop.permute.xlu0 %422  ;;  %v365_v34 = vmul.f32 %v349_v13, %v349_v13  ;;  %v353_v35 = vsub.f32 %v1139_v8, %v1148_v16 }
 0x117   : > { %v545_v46 = vmul.f32 1.442695, %v528_v39  ;;  %v543_v47 = vmul.f32 1.442695, %v527_v40  ;;  %v513_v48 = vadd.f32 %v497_v41, %v358_v36  ;;  %v514_v49 = vadd.f32 %v498_v42, %v359_v37 }
 0x118   : > { %v483_v52 = vsub.f32 %v418_v44, %v1150_v17  ;;  %v484_v53 = vsub.f32 %v423_v45, %v1150_v17  ;;  %v367_v39 = vmul.f32 %v351_v0, %v351_v0  ;;  %v352_v44 = vsub.f32 %v1141_v9, %v1148_v16 }
 0x119   : > { %824 = vpow2.f32 %v545_v46  ;;  %v529_v55 = vmul.f32 -0.5, %v513_v48  ;;  %v530_v56 = vmul.f32 -0.5, %v514_v49 }
 0x11a   : > { %826 = vpow2.f32 %v543_v47  ;;  %v499_v58 = vmul.f32 %v483_v52, %v483_v52  ;;  %v500_v59 = vmul.f32 %v484_v53, %v484_v53  ;;  %v428_v60 = vpop.permute.xlu1 %427  ;;  %v433_v61 = vpop.permute.xlu0 %432  ;;  %v369_v52 = vmul.f32 %v353_v35, %v353_v35 }
 0x11b   : > { %v547_v2 = vmul.f32 1.442695, %v529_v55  ;;  %v549_v62 = vmul.f32 1.442695, %v530_v56  ;;  %v485_v63 = vsub.f32 %v428_v60, %v1150_v17  ;;  %v486_v5 = vsub.f32 %v433_v61, %v1150_v17 }
 0x11c   : > { %v515_v11 = vadd.f32 %v499_v58, %v360_v54  ;;  %v516_v12 = vadd.f32 %v500_v59, %v361_v43  ;;  %v366_v43 = vmul.f32 %v350_v27, %v350_v27  ;;  %v354_v55 = vsub.f32 %v1146_v15, %v1148_v16 }
 0x11d   : > { %828 = vpow2.f32 %v547_v2  ;;  %v501_v1 = vmul.f32 %v485_v63, %v485_v63  ;;  %v502_v18 = vmul.f32 %v486_v5, %v486_v5  ;;  %v368_v59 = vmul.f32 %v352_v44, %v352_v44 }
 0x11e   : > { %830 = vpow2.f32 %v549_v62  ;;  %v531_v20 = vmul.f32 -0.5, %v515_v11  ;;  %v532_v21 = vmul.f32 -0.5, %v516_v12  ;;  %v438_v22 = vpop.permute.xlu1 %437  ;;  %v443_v7 = vpop.permute.xlu0 %442  ;;  %v355_v62 = vsub.f32 %v1144_v14, %v1148_v16 }
 0x11f   : > { %v517_v23 = vadd.f32 %v501_v1, %v362_v10  ;;  %v518_v24 = vadd.f32 %v502_v18, %v363_v6  ;;  %v487_v25 = vsub.f32 %v438_v22, %v1150_v17  ;;  %v488_v26 = vsub.f32 %v443_v7, %v1150_v17 }
 0x120   : > { %v551_v28 = vmul.f32 1.442695, %v531_v20  ;;  %v553_v29 = vmul.f32 1.442695, %v532_v21  ;;  %v370_v18 = vmul.f32 %v354_v55, %v354_v55  ;;  %v371_v7 = vmul.f32 %v355_v62, %v355_v62 }
 0x121   : > { %v533_v30 = vmul.f32 -0.5, %v517_v23  ;;  %v534_v31 = vmul.f32 -0.5, %v518_v24  ;;  %v503_v32 = vmul.f32 %v487_v25, %v487_v25  ;;  %v504_v33 = vmul.f32 %v488_v26, %v488_v26 }
 0x122   : > { %832 = vpow2.f32 %v551_v28  ;;  %v448_v36 = vpop.permute.xlu1 %447  ;;  %v453_v37 = vpop.permute.xlu0 %452 }
 0x123   : > { %834 = vpow2.f32 %v553_v29  ;;  %v555_v3 = vmul.f32 1.442695, %v533_v30  ;;  %v557_v38 = vmul.f32 1.442695, %v534_v31  ;;  %v519_v4 = vadd.f32 %v503_v32, %v364_v19 }
 0x124   : > { %v520_v40 = vadd.f32 %v504_v33, %v365_v34  ;;  %v489_v41 = vsub.f32 %v448_v36, %v1150_v17  ;;  %v490_v42 = vsub.f32 %v453_v37, %v1150_v17 }
 0x125   : > { %836 = vpow2.f32 %v555_v3  ;;  %v535_v8 = vmul.f32 -0.5, %v519_v4 }
 0x126   : > { %v825_v45 = vpop.eup %824  ;;  %838 = vpow2.f32 %v557_v38  ;;  %v536_v46 = vmul.f32 -0.5, %v520_v40  ;;  %v505_v47 = vmul.f32 %v489_v41, %v489_v41  ;;  %v506_v48 = vmul.f32 %v490_v42, %v490_v42  ;;  %v458_v49 = vpop.permute.xlu1 %457 }
 0x127   : > { %v463_v50 = vpop.permute.xlu0 %462  ;;  %v827_v51 = vpop.eup %826  ;;  %576 = vst [vmem:[%s1189_s21 + $0x8] sm:$0xff] %v825_v45  ;;  %v559_v53 = vmul.f32 1.442695, %v535_v8  ;;  %v491_v54 = vsub.f32 %v458_v49, %v1150_v17 }
 0x128   : > { %v492_v9 = vsub.f32 %v463_v50, %v1150_v17  ;;  %575 = vst [vmem:[%s1189_s21] sm:$0xff] %v827_v51  ;;  %v561_v56 = vmul.f32 1.442695, %v536_v46  ;;  %v521_v57 = vadd.f32 %v505_v47, %v366_v43  ;;  %v522_v58 = vadd.f32 %v506_v48, %v367_v39 }
 0x129   : > { %840 = vpow2.f32 %v559_v53  ;;  %v507_v60 = vmul.f32 %v491_v54, %v491_v54 }
 0x12a   : > { %v508_v61 = vmul.f32 %v492_v9, %v492_v9  ;;  %v829_v2 = vpop.eup %828  ;;  %842 = vpow2.f32 %v561_v56  ;;  %v537_v63 = vmul.f32 -0.5, %v521_v57  ;;  %v538_v5 = vmul.f32 -0.5, %v522_v58  ;;  %v468_v6 = vpop.permute.xlu1 %467 }
 0x12b   : > { %v473_v10 = vpop.permute.xlu0 %472  ;;  %v831_v15 = vpop.eup %830  ;;  %577 = vst [vmem:[%s1189_s21 + $0x10] sm:$0xff] %v829_v2  ;;  %v523_v11 = vadd.f32 %v507_v60, %v368_v59  ;;  %v493_v13 = vsub.f32 %v468_v6, %v1150_v17 }
 0x12c   : > { %v524_v12 = vadd.f32 %v508_v61, %v369_v52  ;;  %v494_v1 = vsub.f32 %v473_v10, %v1150_v17  ;;  %578 = vst [vmem:[%s1189_s21 + $0x18] sm:$0xff] %v831_v15  ;;  %v563_v19 = vmul.f32 1.442695, %v537_v63  ;;  %v565_v20 = vmul.f32 1.442695, %v538_v5 }
 0x12d   : > { %v539_v14 = vmul.f32 -0.5, %v523_v11  ;;  %v509_v21 = vmul.f32 %v493_v13, %v493_v13 }
 0x12e   : > { %v540_v16 = vmul.f32 -0.5, %v524_v12  ;;  %v510_v22 = vmul.f32 %v494_v1, %v494_v1  ;;  %844 = vpow2.f32 %v563_v19 }
 0x12f   : > { %v833_v23 = vpop.eup %832  ;;  %846 = vpow2.f32 %v565_v20  ;;  %v567_v24 = vmul.f32 1.442695, %v539_v14  ;;  %v525_v26 = vadd.f32 %v509_v21, %v370_v18 }
 0x130   : > { %v569_v25 = vmul.f32 1.442695, %v540_v16  ;;  %v835_v17 = vpop.eup %834  ;;  %579 = vst [vmem:[%s1189_s21 + $0x20] sm:$0xff] %v833_v23  ;;  %v526_v0 = vadd.f32 %v510_v22, %v371_v7 }
 0x131   : > { %580 = vst [vmem:[%s1189_s21 + $0x28] sm:$0xff] %v835_v17  ;;  %848 = vpow2.f32 %v567_v24  ;;  %v541_v27 = vmul.f32 -0.5, %v525_v26 }
 0x132   : > { %v837_v28 = vpop.eup %836  ;;  %850 = vpow2.f32 %v569_v25  ;;  %v542_v29 = vmul.f32 -0.5, %v526_v0 }
 0x133   : > { %v839_v30 = vpop.eup %838  ;;  %581 = vst [vmem:[%s1189_s21 + $0x30] sm:$0xff] %v837_v28  ;;  %v571_v31 = vmul.f32 1.442695, %v541_v27 }
 0x134   : > { %582 = vst [vmem:[%s1189_s21 + $0x38] sm:$0xff] %v839_v30  ;;  %v573_v32 = vmul.f32 1.442695, %v542_v29 }
 0x135   : > { %852 = vpow2.f32 %v571_v31 }
 0x136   : > { %v841_v33 = vpop.eup %840  ;;  %854 = vpow2.f32 %v573_v32 }
 0x137   : > { %v843_v34 = vpop.eup %842  ;;  %583 = vst [vmem:[%s1189_s21 + $0x40] sm:$0xff] %v841_v33 }
 0x138   : > { %584 = vst [vmem:[%s1189_s21 + $0x48] sm:$0xff] %v843_v34 }
 0x13b   : > { %v845_v35 = vpop.eup %844 }
 0x13c   : > { %v847_v36 = vpop.eup %846  ;;  %585 = vst [vmem:[%s1189_s21 + $0x50] sm:$0xff] %v845_v35 }
 0x13d   : > { %586 = vst [vmem:[%s1189_s21 + $0x58] sm:$0xff] %v847_v36 }
 0x13e   : > { %v849_v37 = vpop.eup %848 }
 0x13f   : > { %v851_v3 = vpop.eup %850  ;;  %587 = vst [vmem:[%s1189_s21 + $0x60] sm:$0xff] %v849_v37 }
 0x140   : > { %588 = vst [vmem:[%s1189_s21 + $0x68] sm:$0xff] %v851_v3 }
 0x142   : > { %v853_v38 = vpop.eup %852 }
 0x143   : > { %v855_v4 = vpop.eup %854  ;;  %589 = vst [vmem:[%s1189_s21 + $0x70] sm:$0xff] %v853_v38 }
 0x144   : > { %590 = vst [vmem:[%s1189_s21 + $0x78] sm:$0xff] %v855_v4 }
 0x145   : > { %884 = shalt.err (!%p881_p4)
}
 0x146   : > { %s885_s10 = scalar_lea.hbm %s1221_s15, 2048  ;;  %s889_s21 = scalar_lea.hbm %s1281_s3, 8192 }
 0x147   : > { %p886_p5 = scmp.ne.s32.totalorder %s1221_s15, %s885_s10  ;;  %p890_p9 = scmp.lt.s32.totalorder %s1221_s15, %s1281_s3 }
 0x148   : > { %p891_p8 = scmp.lt.s32.totalorder %s889_s21, %s885_s10 }
 0x149   : > { %p887_p6 = pnand %p886_p5, %p1048_p3 }
 0x14a   : > { %p892_p10 = por %p891_p8, %p890_p9 }
 0x14b   : > { %p888_p7 = pneg %p887_p6 }
 0x14d   : > { %p893_p11 = pnand %p892_p10, %p888_p7 }
 0x14f   : > { %896 = shalt.err (!%p893_p11)
}
 0x150   : > { %s973_s29 = smov 128   ;;  %s974_s30 = smov 256  }
 0x151   : > { %s975_s4 = smov 8  }
 0x152   : > { %733 = dma.vmem_to_hbm [thread:$0]  (%p1048_p3), %s1216_s28, 2048, %s1221_s15, %s1227_s16, %s973_s29, %s974_s30, %s975_s4  }
 0x153 PF: > { %p745_p12 = scmp.ge.s32.totalorder %s967_s19, 2  ;;  %s622_s5 = sand.u32 1, %s939_s12  }
 0x154   : > { %p1286_p13 = scmp.ne.s32.totalorder %s1283_s27, 0  ;;  %s623_s6 = scalar_lea.sflag [#allocation3], %s622_s5 }
 0x156   : > { %p740_p0 = pnand %p745_p12, %p1286_p13 }
 0x158   : > { %p741_p1 = pneg %p740_p0 }
 0x15a   : > { %934 = dma.done.wait (%p741_p1), %s623_s6, 2048  }
 0x15b   : > { %936 = vsyncadd (%p741_p1), %s623_s6, 4294965248  ;;  %s17_s19 = sadd.s32 1, %s967_s19   ;;  %s1287_s12 = smov %s943_s13 }
 0x15c   : > { %p14_p2 = scmp.ge.s32.totalorder %s17_s19, 6   ;;  %s1288_s13 = smov %s947_s14 }
 0x15d   : > { %s1289_s14 = smov %s1078_s8  ;;  %s1290_s15 = smov %s959_s17 }
 0x15e   : > { %s1291_s16 = smov %s963_s18  ;;  %s1292_s17 = smov %s1295_s22 }
 0x15f   : > { %s1293_s18 = smov %s1299_s23  ;;  %16 = sbr.rel (!%p14_p2) target bundleno = 6 (0x6), region = 75 }
 0x164   :  { %628 = vsyncpa [#allocation3], 1 }
 0x165   :  { %630 = vsyncpa [#allocation3 + $0x1], 1 }
 0x166   :  { %631 = vsyncpa [#allocation4], 1 }
 0x167   :  { %633 = vsyncpa [#allocation4 + $0x1], 1 }

</bundles_post_ra>
